<compile_context>
chip_gen: v7x
topology: tpu7x:2x2x1
jax: 0.10.0
libtpu: 0.0.40
codegen_flags: <defaults>
</compile_context>

<pallas_src>
import jax
import jax.numpy as jnp
from jax.experimental import pallas as pl
from jax.experimental.pallas import tpu as pltpu


def _round_up(x, m):
    return (x + m - 1) // m * m


def _model_kernel(x_ref, w1_ref, b1_ref, w2_ref, b2_ref, wt_ref, bt_ref, out_ref):
    # gcn_layer1: ONE packed-K MXU matmul (hoie_dense1/2, the [ri, ri] concat and
    # the [s, p, o, s_hoie, o_hoie] concat are pre-folded into x / w1 / b1).
    h = jnp.dot(x_ref[...], w1_ref[...], preferred_element_type=jnp.float32)
    h = jnp.maximum(h + b1_ref[...], 0.0)

    # gcn_layer2 (ReLU).
    h = jnp.dot(h.astype(w2_ref.dtype), w2_ref[...], preferred_element_type=jnp.float32)
    h = jnp.maximum(h + b2_ref[...], 0.0)

    # Collapsed conv1d_1+bn1 -> conv1d_2+bn2 -> dense1+bn3 -> dense2 tail
    # (dropout = identity in eval): VPU multiply + lane reduction -> per-row logit.
    logit = jnp.sum(h * wt_ref[...], axis=-1, keepdims=True) + bt_ref[0, 0]  # (TB, 1)

    if out_ref.shape[0] == 1:
        # Lane-dense epilogue: (1, TB) sigmoid + unmasked full-lane stores.
        out_ref[...] = jax.nn.sigmoid(jnp.transpose(logit))
    else:
        # Conservative fallback layout: (TB, 1) column output.
        out_ref[...] = jax.nn.sigmoid(logit)


def model_with_hoie_forward(inputs, params, *, batch_tile=512):
    """Inference forward of ModelWithHoIE. inputs: (B, 3) int32 triples [s, p, o]."""
    s_idx, p_idx, o_idx = inputs[:, 0], inputs[:, 1], inputs[:, 2]

    ent, rel, hoie = params["entity_emb"], params["relation_emb"], params["hoie_emb"]
    E = ent.shape[1]
    H = hoie.shape[1] // 2
    G = params["w_g2"].shape[0]
    K = 3 * E + 2 * H
    LANE = 128
    Gp = _round_up(G, LANE)
    Kp = _round_up(K, LANE)
    cdt = jnp.bfloat16   # MXU operand dtype; accumulation / elementwise stay f32
    eps = 1e-5

    def bn_affine(bn):
        s = bn["gamma"] / jnp.sqrt(bn["var"] + eps)
        return s, bn["beta"] - bn["mean"] * s

    s1, t1 = bn_affine(params["bn1"])
    s2, t2 = bn_affine(params["bn2"])
    s3, t3 = bn_affine(params["bn3"])

    # --- fold hoie_dense1 + hoie_dense2 (comb = [ri, ri], no activation between) ---
    w_hd1, b_hd1 = params["w_hd1"], params["b_hd1"]
    w_hd2, b_hd2 = params["w_hd2"], params["b_hd2"]
    w_hoie = (w_hd1[:H] + w_hd1[H:]) @ w_hd2             # (H, H)
    b_hoie = b_hd1 @ w_hd2 + b_hd2                       # (H,)

    # --- fold the hoie affine into w_g1's hoie row blocks and restack everything
    #     into ONE packed (Kp, Gp) layer-1 weight (single MXU matmul in-kernel) ---
    w_g1, b_g1 = params["w_g1"], params["b_g1"]
    wg1_s, wg1_p, wg1_o = w_g1[:E], w_g1[E:2 * E], w_g1[2 * E:3 * E]
    wg1_hs_raw, wg1_ho_raw = w_g1[3 * E:3 * E + H], w_g1[3 * E + H:]
    w1 = jnp.concatenate(
        [wg1_s, wg1_p, wg1_o, w_hoie @ wg1_hs_raw, w_hoie @ wg1_ho_raw], axis=0)  # (K, G)
    b1 = b_g1 + b_hoie @ wg1_hs_raw + b_hoie @ wg1_ho_raw                          # (G,)

    # --- collapse the activation-free tail into one (G,) vector + scalar bias ---
    A1 = params["w_c1"] * s1[None, :]; a1 = params["b_c1"] * s1 + t1
    A2 = params["w_c2"] * s2[None, :]; a2 = params["b_c2"] * s2 + t2
    A3 = params["w_d1"] * s3[None, :]; a3 = params["b_d1"] * s3 + t3
    A4 = params["w_d2"];               a4 = params["b_d2"]
    w_tail = (A1 @ (A2 @ (A3 @ A4)))[:, 0]               # (G,)  kept in f32
    b_tail = ((a1 @ A2 + a2) @ A3 + a3) @ A4 + a4        # (1,)

    # --- pad lane dims to multiples of 128; matmul weights to bf16, the rest f32 ---
    w1 = jnp.pad(w1, ((0, Kp - K), (0, Gp - G))).astype(cdt)
    w2 = jnp.pad(params["w_g2"], ((0, Gp - G), (0, Gp - G))).astype(cdt)
    b1 = jnp.pad(b1, (0, Gp - G)).reshape(1, Gp).astype(jnp.float32)
    b2 = jnp.pad(params["b_g2"], (0, Gp - G)).reshape(1, Gp).astype(jnp.float32)
    w_tail = jnp.pad(w_tail, (0, Gp - G)).reshape(1, Gp).astype(jnp.float32)
    b_tail = b_tail.reshape(1, 1).astype(jnp.float32)    # SMEM scalar

    # --- gathers + HolE product + concat in the XLA wrapper (fused into the gather
    #     epilogue): ONE packed bf16 (B, Kp) activation fed to the kernel ---
    # TODO(synk): for very large serving batches, fuse the gathers into the kernel
    # via scalar-prefetched indices + manual per-row DMA to skip the HBM round trip.
    hs, ho = hoie[s_idx], hoie[o_idx]
    ri_s = hs[:, :H] * hs[:, H:]                         # real*img computed in f32
    ri_o = ho[:, :H] * ho[:, H:]
    x_in = jnp.concatenate(
        [ent[s_idx], rel[p_idx], ent[o_idx], ri_s, ri_o], axis=1).astype(cdt)

    # --- batch tiling: lane-dense (1, Bp) output => multi-step tiles are 128-mult;
    #     small batches run in a single 16-aligned tile (bf16 sublane packing).
    #     B > 128 always yields >= 2 grid steps so v7x's two TCs both get work. ---
    B = inputs.shape[0]
    if B <= LANE:
        TB = _round_up(B, 16)
    else:
        TB = min(_round_up(batch_tile, LANE),
                 max(LANE, _round_up(_round_up(B, LANE) // 2, LANE)))
    Bp = _round_up(B, TB)
    num_steps = Bp // TB
    x_in = jnp.pad(x_in, ((0, Bp - B), (0, Kp - K)))

    args = (x_in, w1, b1, w2, b2, w_tail, b_tail)

    flops = 2 * Bp * Gp * (Kp + Gp) + 4 * Bp * Gp
    bytes_accessed = (Bp * Kp * 2                     # packed bf16 activations
                      + (Kp + Gp) * Gp * 2            # bf16 weights
                      + 3 * Gp * 4 + 4                # f32 biases / tail
                      + Bp * 4)                       # f32 output
    vmem_limit = int(min(
        100 * 1024 * 1024,
        max(32 * 1024 * 1024,
            2 * ((Kp + Gp) * Gp * 2 + 3 * Gp * 4)     # resident weights (<= 2 buffers)
            + 2 * (TB * Kp * 2 + TB * 4)              # activation / output buffers
            + 8 * TB * Gp * 4)))                      # f32 intermediates headroom

    def build_and_call(lane_dense_out, single_buffer_weights):
        def resident(a):  # VMEM-resident weights: constant block index across steps
            kw = {"pipeline_mode": pl.Buffered(1)} if single_buffer_weights else {}
            return pl.BlockSpec(a.shape, lambda i: (0, 0), **kw)

        in_specs = [
            pl.BlockSpec((TB, Kp), lambda i: (i, 0)),                # batch-tiled acts
            resident(w1), resident(b1), resident(w2), resident(b2), resident(w_tail),
            pl.BlockSpec(memory_space=pltpu.MemorySpace.SMEM),       # scalar tail bias
        ]
        if lane_dense_out:
            out_shape = jax.ShapeDtypeStruct((1, Bp), jnp.float32)
            out_spec = pl.BlockSpec((1, TB), lambda i: (0, i))
        else:
            out_shape = jax.ShapeDtypeStruct((Bp, 1), jnp.float32)
            out_spec = pl.BlockSpec((TB, 1), lambda i: (i, 0))

        out = pl.pallas_call(
            _model_kernel,
            out_shape=out_shape,
            grid_spec=pltpu.PrefetchScalarGridSpec(
                num_scalar_prefetch=0,
                grid=(num_steps,),
                in_specs=in_specs,
                out_specs=out_spec,
            ),
            compiler_params=pltpu.CompilerParams(
                dimension_semantics=("parallel",),
                vmem_limit_bytes=vmem_limit),
            cost_estimate=pl.CostEstimate(
                flops=flops, transcendentals=Bp, bytes_accessed=bytes_accessed),
        )(*args)
        return out.reshape(Bp, 1) if lane_dense_out else out

    try:
        out = build_and_call(True, True)
    except Exception:
        # Fall back to the previously-validated conservative layout if single
        # buffering or the lane-dense epilogue is unsupported on this backend.
        out = build_and_call(False, False)
    return out[:B]


def init_params(key, num_entities, num_relations, E, H, G):
    ks = jax.random.split(key, 20)

    def norm(k, shape, scale=0.1):
        return (scale * jax.random.normal(k, shape)).astype(jnp.float32)

    params = {
        "entity_emb": norm(ks[0], (num_entities, E), 1.0),
        "relation_emb": norm(ks[1], (num_relations, E), 1.0),
        "hoie_emb": norm(ks[2], (num_entities, 2 * H), 1.0),
        # Linear weights stored pre-transposed as (in, out); y = x @ W + b
        "w_hd1": norm(ks[3], (2 * H, H)), "b_hd1": norm(ks[4], (H,)),
        "w_hd2": norm(ks[5], (H, H)), "b_hd2": norm(ks[6], (H,)),
        "w_g1": norm(ks[7], (3 * E + 2 * H, G)), "b_g1": norm(ks[8], (G,)),
        "w_g2": norm(ks[9], (G, G)), "b_g2": norm(ks[10], (G,)),
        "b_c1": norm(ks[12], (128,)),
        "b_c2": norm(ks[14], (256,)),
        "w_d1": norm(ks[15], (256, 512)), "b_d1": norm(ks[16], (512,)),
        "w_d2": norm(ks[17], (512, 1)), "b_d2": norm(ks[18], (1,)),
    }
    # Conv weights in torch layout (out_ch, in_ch, k); on a length-1 sequence
    # with padding=1 only the middle tap [:, :, 1] contributes.
    conv1_w = norm(ks[11], (128, G, 3))
    conv2_w = norm(ks[13], (256, 128, 3))
    params["w_c1"] = jnp.transpose(conv1_w[:, :, 1])   # (G, 128)
    params["w_c2"] = jnp.transpose(conv2_w[:, :, 1])   # (128, 256)

    # BatchNorm1d params (eval-mode running statistics)
    def bn(kg, kb, n):
        return {
            "gamma": (1.0 + 0.05 * jax.random.normal(kg, (n,))).astype(jnp.float32),
            "beta": (0.05 * jax.random.normal(kb, (n,))).astype(jnp.float32),
            "mean": jnp.zeros((n,), jnp.float32),
            "var": jnp.ones((n,), jnp.float32),
        }

    kbn = jax.random.split(ks[19], 6)
    params["bn1"] = bn(kbn[0], kbn[1], 128)
    params["bn2"] = bn(kbn[2], kbn[3], 256)
    params["bn3"] = bn(kbn[4], kbn[5], 512)
    return params


def reference_forward(inputs, params):
    """Pure-JAX f32 reference, mirroring the torch forward in eval mode."""
    s_idx, p_idx, o_idx = inputs[:, 0], inputs[:, 1], inputs[:, 2]
    ent, rel, hoie = params["entity_emb"], params["relation_emb"], params["hoie_emb"]
    H = hoie.shape[1] // 2

    def hoie_branch(h):
        real, img = h[:, :H], h[:, H:]
        comb = jnp.concatenate([real * img, real * img], axis=-1)
        x = comb @ params["w_hd1"] + params["b_hd1"]
        return x @ params["w_hd2"] + params["b_hd2"]

    s_hoie = hoie_branch(hoie[s_idx])
    o_hoie = hoie_branch(hoie[o_idx])
    x = jnp.concatenate([ent[s_idx], rel[p_idx], ent[o_idx], s_hoie, o_hoie], axis=1)
    x = jax.nn.relu(x @ params["w_g1"] + params["b_g1"])
    x = jax.nn.relu(x @ params["w_g2"] + params["b_g2"])

    eps = 1e-5

    def bn(v, p):
        s = p["gamma"] / jnp.sqrt(p["var"] + eps)
        return v * s + (p["beta"] - p["mean"] * s)

    x = bn(x @ params["w_c1"] + params["b_c1"], params["bn1"])   # conv1d_1 (middle tap)
    x = bn(x @ params["w_c2"] + params["b_c2"], params["bn2"])   # conv1d_2 (middle tap)
    x = bn(x @ params["w_d1"] + params["b_d1"], params["bn3"])   # dense1
    x = x @ params["w_d2"] + params["b_d2"]                      # dense2
    return jax.nn.sigmoid(x)


if __name__ == "__main__":
    key = jax.random.PRNGKey(0)
    num_entities, num_relations = 16, 8
    E, H, G, B = 32, 16, 64, 8   # embedding_dim, hoie_embedding_dim, gcn_units, batch

    k_params, k_s, k_p, k_o = jax.random.split(key, 4)
    params = init_params(k_params, num_entities, num_relations, E, H, G)

    s = jax.random.randint(k_s, (B,), 0, num_entities)
    p = jax.random.randint(k_p, (B,), 0, num_relations)
    o = jax.random.randint(k_o, (B,), 0, num_entities)
    inputs = jnp.stack([s, p, o], axis=1).astype(jnp.int32)

    out = model_with_hoie_forward(inputs, params)
    out = jax.block_until_ready(out)

    assert out.shape == (B, 1)
    assert bool(jnp.all(jnp.isfinite(out)))
    assert bool(jnp.all((out >= 0.0) & (out <= 1.0)))

    ref = jax.block_until_ready(reference_forward(inputs, params))
    max_err = float(jnp.max(jnp.abs(out - ref)))
    assert max_err < 5e-2, f"kernel vs reference mismatch: {max_err}"

    print("KERNEL_OK")
</pallas_src>

<mosaic_0001>
module attributes {stable_mosaic.version = 11 : i64} {
  func.func @_model_kernel(%arg0: i32, %arg1: memref<16x128xbf16, #tpu.memory_space<vmem>>, %arg2: memref<128x128xbf16, #tpu.memory_space<vmem>>, %arg3: memref<1x128xf32, #tpu.memory_space<vmem>>, %arg4: memref<128x128xbf16, #tpu.memory_space<vmem>>, %arg5: memref<1x128xf32, #tpu.memory_space<vmem>>, %arg6: memref<1x128xf32, #tpu.memory_space<vmem>>, %arg7: memref<1x1xf32, #tpu.memory_space<smem>>, %arg8: memref<1x16xf32, #tpu.memory_space<vmem>>) attributes {dimension_semantics = [#tpu.dimension_semantics<parallel>], iteration_bounds = array<i64: 1>, scalar_prefetch = 0 : i64, scratch_operands = 0 : i64, tpu.core_type = #tpu.core_type<tc>, window_params = [{transform_indices = @transform_0, window_bounds = array<i64: 16, 128>}, {pipeline_mode = #tpu.pipeline_mode<synchronous>, transform_indices = @transform_1, window_bounds = array<i64: 128, 128>}, {pipeline_mode = #tpu.pipeline_mode<synchronous>, transform_indices = @transform_2, window_bounds = array<i64: 1, 128>}, {pipeline_mode = #tpu.pipeline_mode<synchronous>, transform_indices = @transform_3, window_bounds = array<i64: 128, 128>}, {pipeline_mode = #tpu.pipeline_mode<synchronous>, transform_indices = @transform_4, window_bounds = array<i64: 1, 128>}, {pipeline_mode = #tpu.pipeline_mode<synchronous>, transform_indices = @transform_5, window_bounds = array<i64: 1, 128>}, {transform_indices = @transform_6, window_bounds = array<i64: 1, 1>}, {transform_indices = @transform_7, window_bounds = array<i64: 1, 16>}]} {
    %c0 = arith.constant 0 : index
    %c0_0 = arith.constant 0 : index
    %0 = vector.load %arg1[%c0, %c0_0] : memref<16x128xbf16, #tpu.memory_space<vmem>>, vector<16x128xbf16>
    %c0_1 = arith.constant 0 : index
    %c0_2 = arith.constant 0 : index
    %1 = vector.load %arg2[%c0_1, %c0_2] : memref<128x128xbf16, #tpu.memory_space<vmem>>, vector<128x128xbf16>
    %cst = arith.constant dense<0.000000e+00> : vector<16x128xf32>
    %2 = tpu.matmul %0, %1, %cst {dimension_numbers = #tpu.dot_dimension_numbers<[1], [0], [0], [1], [0, 0, 1, 1], [], []>} : vector<16x128xbf16>, vector<128x128xbf16>, vector<16x128xf32> -> vector<16x128xf32>
    %c0_3 = arith.constant 0 : index
    %c0_4 = arith.constant 0 : index
    %3 = vector.load %arg3[%c0_3, %c0_4] : memref<1x128xf32, #tpu.memory_space<vmem>>, vector<1x128xf32>
    %4 = vector.broadcast %3 : vector<1x128xf32> to vector<16x128xf32>
    %5 = arith.addf %2, %4 : vector<16x128xf32>
    %cst_5 = arith.constant 0.000000e+00 : f32
    %6 = vector.broadcast %cst_5 : f32 to vector<16x128xf32>
    %7 = arith.maximumf %5, %6 : vector<16x128xf32>
    %8 = arith.truncf %7 : vector<16x128xf32> to vector<16x128xbf16>
    %c0_6 = arith.constant 0 : index
    %c0_7 = arith.constant 0 : index
    %9 = vector.load %arg4[%c0_6, %c0_7] : memref<128x128xbf16, #tpu.memory_space<vmem>>, vector<128x128xbf16>
    %cst_8 = arith.constant dense<0.000000e+00> : vector<16x128xf32>
    %10 = tpu.matmul %8, %9, %cst_8 {dimension_numbers = #tpu.dot_dimension_numbers<[1], [0], [0], [1], [0, 0, 1, 1], [], []>} : vector<16x128xbf16>, vector<128x128xbf16>, vector<16x128xf32> -> vector<16x128xf32>
    %c0_9 = arith.constant 0 : index
    %c0_10 = arith.constant 0 : index
    %11 = vector.load %arg5[%c0_9, %c0_10] : memref<1x128xf32, #tpu.memory_space<vmem>>, vector<1x128xf32>
    %12 = vector.broadcast %11 : vector<1x128xf32> to vector<16x128xf32>
    %13 = arith.addf %10, %12 : vector<16x128xf32>
    %cst_11 = arith.constant 0.000000e+00 : f32
    %14 = vector.broadcast %cst_11 : f32 to vector<16x128xf32>
    %15 = arith.maximumf %13, %14 : vector<16x128xf32>
    %c0_12 = arith.constant 0 : index
    %c0_13 = arith.constant 0 : index
    %16 = vector.load %arg6[%c0_12, %c0_13] : memref<1x128xf32, #tpu.memory_space<vmem>>, vector<1x128xf32>
    %17 = vector.broadcast %16 : vector<1x128xf32> to vector<16x128xf32>
    %18 = arith.mulf %15, %17 : vector<16x128xf32>
    %cst_14 = arith.constant dense<0.000000e+00> : vector<16xf32>
    %19 = vector.multi_reduction <add>, %18, %cst_14 [1] : vector<16x128xf32> to vector<16xf32>
    %20 = vector.shape_cast %19 : vector<16xf32> to vector<16x1xf32>
    %c0_15 = arith.constant 0 : index
    %c0_16 = arith.constant 0 : index
    %21 = memref.load %arg7[%c0_15, %c0_16] : memref<1x1xf32, #tpu.memory_space<smem>>
    %22 = vector.broadcast %21 : f32 to vector<16x1xf32>
    %23 = arith.addf %20, %22 : vector<16x1xf32>
    %24 = tpu.transpose %23, [1, 0] : vector<16x1xf32> -> vector<1x16xf32>
    %25 = arith.negf %24 : vector<1x16xf32>
    %26 = math.exp %25 : vector<1x16xf32>
    %cst_17 = arith.constant 1.000000e+00 : f32
    %27 = vector.broadcast %cst_17 : f32 to vector<1x16xf32>
    %28 = arith.addf %27, %26 : vector<1x16xf32>
    %29 = arith.divf %27, %28 : vector<1x16xf32>
    %c0_18 = arith.constant 0 : index
    %c0_19 = arith.constant 0 : index
    %30 = vector.load %arg8[%c0_18, %c0_19] : memref<1x16xf32, #tpu.memory_space<vmem>>, vector<1x16xf32>
    tpu.vector_store %arg8[%c0_18, %c0_19], %29 {strides = array<i32>} : memref<1x16xf32, #tpu.memory_space<vmem>>, vector<1x16xf32>,
    return
  }
  func.func @transform_0(%arg0: i32) -> (i32, i32) {
    %c0_i32 = arith.constant 0 : i32
    %c0_i32_0 = arith.constant 0 : i32
    return %arg0, %c0_i32 : i32, i32
  }
  func.func @transform_1(%arg0: i32) -> (i32, i32) {
    %c0_i32 = arith.constant 0 : i32
    %c0_i32_0 = arith.constant 0 : i32
    %c0_i32_1 = arith.constant 0 : i32
    return %c0_i32, %c0_i32_0 : i32, i32
  }
  func.func @transform_2(%arg0: i32) -> (i32, i32) {
    %c0_i32 = arith.constant 0 : i32
    %c0_i32_0 = arith.constant 0 : i32
    %c0_i32_1 = arith.constant 0 : i32
    return %c0_i32, %c0_i32_0 : i32, i32
  }
  func.func @transform_3(%arg0: i32) -> (i32, i32) {
    %c0_i32 = arith.constant 0 : i32
    %c0_i32_0 = arith.constant 0 : i32
    %c0_i32_1 = arith.constant 0 : i32
    return %c0_i32, %c0_i32_0 : i32, i32
  }
  func.func @transform_4(%arg0: i32) -> (i32, i32) {
    %c0_i32 = arith.constant 0 : i32
    %c0_i32_0 = arith.constant 0 : i32
    %c0_i32_1 = arith.constant 0 : i32
    return %c0_i32, %c0_i32_0 : i32, i32
  }
  func.func @transform_5(%arg0: i32) -> (i32, i32) {
    %c0_i32 = arith.constant 0 : i32
    %c0_i32_0 = arith.constant 0 : i32
    %c0_i32_1 = arith.constant 0 : i32
    return %c0_i32, %c0_i32_0 : i32, i32
  }
  func.func @transform_6(%arg0: i32) -> (i32, i32) {
    %c0_i32 = arith.constant 0 : i32
    %c0_i32_0 = arith.constant 0 : i32
    %c0_i32_1 = arith.constant 0 : i32
    return %c0_i32, %c0_i32_0 : i32, i32
  }
  func.func @transform_7(%arg0: i32) -> (i32, i32) {
    %c0_i32 = arith.constant 0 : i32
    %c0_i32_0 = arith.constant 0 : i32
    return %c0_i32, %arg0 : i32, i32
  }
}

module attributes {stable_mosaic.version = 11 : i64} {
  func.func @_model_kernel(%arg0: i32, %arg1: memref<16x128xbf16, #tpu.memory_space<vmem>>, %arg2: memref<128x128xbf16, #tpu.memory_space<vmem>>, %arg3: memref<1x128xf32, #tpu.memory_space<vmem>>, %arg4: memref<128x128xbf16, #tpu.memory_space<vmem>>, %arg5: memref<1x128xf32, #tpu.memory_space<vmem>>, %arg6: memref<1x128xf32, #tpu.memory_space<vmem>>, %arg7: memref<1x1xf32, #tpu.memory_space<smem>>, %arg8: memref<16x1xf32, #tpu.memory_space<vmem>>) attributes {dimension_semantics = [#tpu.dimension_semantics<parallel>], iteration_bounds = array<i64: 1>, scalar_prefetch = 0 : i64, scratch_operands = 0 : i64, tpu.core_type = #tpu.core_type<tc>, window_params = [{transform_indices = @transform_0, window_bounds = array<i64: 16, 128>}, {pipeline_mode = #tpu.pipeline_mode<synchronous>, transform_indices = @transform_1, window_bounds = array<i64: 128, 128>}, {pipeline_mode = #tpu.pipeline_mode<synchronous>, transform_indices = @transform_2, window_bounds = array<i64: 1, 128>}, {pipeline_mode = #tpu.pipeline_mode<synchronous>, transform_indices = @transform_3, window_bounds = array<i64: 128, 128>}, {pipeline_mode = #tpu.pipeline_mode<synchronous>, transform_indices = @transform_4, window_bounds = array<i64: 1, 128>}, {pipeline_mode = #tpu.pipeline_mode<synchronous>, transform_indices = @transform_5, window_bounds = array<i64: 1, 128>}, {transform_indices = @transform_6, window_bounds = array<i64: 1, 1>}, {transform_indices = @transform_7, window_bounds = array<i64: 16, 1>}]} {
    %c0 = arith.constant 0 : index
    %c0_0 = arith.constant 0 : index
    %0 = vector.load %arg1[%c0, %c0_0] : memref<16x128xbf16, #tpu.memory_space<vmem>>, vector<16x128xbf16>
    %c0_1 = arith.constant 0 : index
    %c0_2 = arith.constant 0 : index
    %1 = vector.load %arg2[%c0_1, %c0_2] : memref<128x128xbf16, #tpu.memory_space<vmem>>, vector<128x128xbf16>
    %cst = arith.constant dense<0.000000e+00> : vector<16x128xf32>
    %2 = tpu.matmul %0, %1, %cst {dimension_numbers = #tpu.dot_dimension_numbers<[1], [0], [0], [1], [0, 0, 1, 1], [], []>} : vector<16x128xbf16>, vector<128x128xbf16>, vector<16x128xf32> -> vector<16x128xf32>
    %c0_3 = arith.constant 0 : index
    %c0_4 = arith.constant 0 : index
    %3 = vector.load %arg3[%c0_3, %c0_4] : memref<1x128xf32, #tpu.memory_space<vmem>>, vector<1x128xf32>
    %4 = vector.broadcast %3 : vector<1x128xf32> to vector<16x128xf32>
    %5 = arith.addf %2, %4 : vector<16x128xf32>
    %cst_5 = arith.constant 0.000000e+00 : f32
    %6 = vector.broadcast %cst_5 : f32 to vector<16x128xf32>
    %7 = arith.maximumf %5, %6 : vector<16x128xf32>
    %8 = arith.truncf %7 : vector<16x128xf32> to vector<16x128xbf16>
    %c0_6 = arith.constant 0 : index
    %c0_7 = arith.constant 0 : index
    %9 = vector.load %arg4[%c0_6, %c0_7] : memref<128x128xbf16, #tpu.memory_space<vmem>>, vector<128x128xbf16>
    %cst_8 = arith.constant dense<0.000000e+00> : vector<16x128xf32>
    %10 = tpu.matmul %8, %9, %cst_8 {dimension_numbers = #tpu.dot_dimension_numbers<[1], [0], [0], [1], [0, 0, 1, 1], [], []>} : vector<16x128xbf16>, vector<128x128xbf16>, vector<16x128xf32> -> vector<16x128xf32>
    %c0_9 = arith.constant 0 : index
    %c0_10 = arith.constant 0 : index
    %11 = vector.load %arg5[%c0_9, %c0_10] : memref<1x128xf32, #tpu.memory_space<vmem>>, vector<1x128xf32>
    %12 = vector.broadcast %11 : vector<1x128xf32> to vector<16x128xf32>
    %13 = arith.addf %10, %12 : vector<16x128xf32>
    %cst_11 = arith.constant 0.000000e+00 : f32
    %14 = vector.broadcast %cst_11 : f32 to vector<16x128xf32>
    %15 = arith.maximumf %13, %14 : vector<16x128xf32>
    %c0_12 = arith.constant 0 : index
    %c0_13 = arith.constant 0 : index
    %16 = vector.load %arg6[%c0_12, %c0_13] : memref<1x128xf32, #tpu.memory_space<vmem>>, vector<1x128xf32>
    %17 = vector.broadcast %16 : vector<1x128xf32> to vector<16x128xf32>
    %18 = arith.mulf %15, %17 : vector<16x128xf32>
    %cst_14 = arith.constant dense<0.000000e+00> : vector<16xf32>
    %19 = vector.multi_reduction <add>, %18, %cst_14 [1] : vector<16x128xf32> to vector<16xf32>
    %20 = vector.shape_cast %19 : vector<16xf32> to vector<16x1xf32>
    %c0_15 = arith.constant 0 : index
    %c0_16 = arith.constant 0 : index
    %21 = memref.load %arg7[%c0_15, %c0_16] : memref<1x1xf32, #tpu.memory_space<smem>>
    %22 = vector.broadcast %21 : f32 to vector<16x1xf32>
    %23 = arith.addf %20, %22 : vector<16x1xf32>
    %24 = arith.negf %23 : vector<16x1xf32>
    %25 = math.exp %24 : vector<16x1xf32>
    %cst_17 = arith.constant 1.000000e+00 : f32
    %26 = vector.broadcast %cst_17 : f32 to vector<16x1xf32>
    %27 = arith.addf %26, %25 : vector<16x1xf32>
    %28 = arith.divf %26, %27 : vector<16x1xf32>
    %c0_18 = arith.constant 0 : index
    %c0_19 = arith.constant 0 : index
    %29 = vector.load %arg8[%c0_18, %c0_19] : memref<16x1xf32, #tpu.memory_space<vmem>>, vector<16x1xf32>
    tpu.vector_store %arg8[%c0_18, %c0_19], %28 {strides = array<i32>} : memref<16x1xf32, #tpu.memory_space<vmem>>, vector<16x1xf32>,
    return
  }
  func.func @transform_0(%arg0: i32) -> (i32, i32) {
    %c0_i32 = arith.constant 0 : i32
    %c0_i32_0 = arith.constant 0 : i32
    return %arg0, %c0_i32 : i32, i32
  }
  func.func @transform_1(%arg0: i32) -> (i32, i32) {
    %c0_i32 = arith.constant 0 : i32
    %c0_i32_0 = arith.constant 0 : i32
    %c0_i32_1 = arith.constant 0 : i32
    return %c0_i32, %c0_i32_0 : i32, i32
  }
  func.func @transform_2(%arg0: i32) -> (i32, i32) {
    %c0_i32 = arith.constant 0 : i32
    %c0_i32_0 = arith.constant 0 : i32
    %c0_i32_1 = arith.constant 0 : i32
    return %c0_i32, %c0_i32_0 : i32, i32
  }
  func.func @transform_3(%arg0: i32) -> (i32, i32) {
    %c0_i32 = arith.constant 0 : i32
    %c0_i32_0 = arith.constant 0 : i32
    %c0_i32_1 = arith.constant 0 : i32
    return %c0_i32, %c0_i32_0 : i32, i32
  }
  func.func @transform_4(%arg0: i32) -> (i32, i32) {
    %c0_i32 = arith.constant 0 : i32
    %c0_i32_0 = arith.constant 0 : i32
    %c0_i32_1 = arith.constant 0 : i32
    return %c0_i32, %c0_i32_0 : i32, i32
  }
  func.func @transform_5(%arg0: i32) -> (i32, i32) {
    %c0_i32 = arith.constant 0 : i32
    %c0_i32_0 = arith.constant 0 : i32
    %c0_i32_1 = arith.constant 0 : i32
    return %c0_i32, %c0_i32_0 : i32, i32
  }
  func.func @transform_6(%arg0: i32) -> (i32, i32) {
    %c0_i32 = arith.constant 0 : i32
    %c0_i32_0 = arith.constant 0 : i32
    %c0_i32_1 = arith.constant 0 : i32
    return %c0_i32, %c0_i32_0 : i32, i32
  }
  func.func @transform_7(%arg0: i32) -> (i32, i32) {
    %c0_i32 = arith.constant 0 : i32
    %c0_i32_0 = arith.constant 0 : i32
    return %arg0, %c0_i32 : i32, i32
  }
}

</mosaic_0001>

<bundles_post_ra>
// kernel: tpu_custom_call.1
= control target key start
LH: loop header
LB: loop body
LE: loop exit
PB: predicated region body
PF: predicated region fallthrough
CT: control target
= control target key end

     0   :  { %13 = vsyncpa [#allocation4], 0  ;;  %s706_s0 = inlined_call_operand.hbm [shape: bf16[16,128], index: 0, kind: input, shape index: {}]   ;;  %s707_s1 = inlined_call_operand.hbm [shape: bf16[128,128], index: 1, kind: input, shape index: {}]   ;;  %s708_s2 = inlined_call_operand.vmem [shape: f32[1,128], index: 2, kind: input, shape index: {}]   ;;  %s709_s3 = inlined_call_operand.hbm [shape: bf16[128,128], index: 3, kind: input, shape index: {}]   ;;  %s710_s4 = inlined_call_operand.vmem [shape: f32[1,128], index: 4, kind: input, shape index: {}]   ;;  %s711_s5 = inlined_call_operand.vmem [shape: f32[1,128], index: 5, kind: input, shape index: {}]   ;;  %s712_s6 = inlined_call_operand.<no memory space> [shape: f32[1,1], index: 6, kind: input, shape index: {}]   ;;  %s713_s7 = inlined_call_operand.hbm [shape: f32[1,16], index: 7, kind: output, shape index: {}]  }
   0x1   :  { %14 = vsyncpa [#allocation7], 0 }
   0x2   :  { %15 = vsyncpa [#allocation5], 0  ;;  %s582_s24 = smov [#allocation6]   ;;  %s583_s26 = smov [#allocation3]  }
   0x3   :  { %s33_s25 = sshll.u32 %s582_s24, 4  ;;  %s21_s27 = sshll.u32 %s583_s26, 4  ;;  %s34_s25 = int_to_ptr.vmem [resolvable:$true] %s33_s25  ;;  %s630_s27 = int_to_ptr.vmem [resolvable:$true] %s21_s27 }
   0x4   :  { %s488_s30 = scalar_lea.hbm %s707_s1, 1024 }
   0x5   :  { %p489_p0 = scmp.ne.s32.totalorder %s707_s1, %s488_s30  ;;  %p492_p1 = scmp.lt.u32.totalorder %s488_s30, %s707_s1 }
   0x7   :  { %p494_p2 = pnand %p492_p1, %p489_p0 }
   0x9   :  { %497 = shalt.err (!%p494_p2)
}
   0xa   :  { %s498_s12 = scalar_lea.vmem %s34_s25, 1024  ;;  %p503_p4 = scmp.lt.s32.totalorder %s34_s25, %s34_s25 }
   0xb   :  { %p499_p3 = scmp.ne.s32.totalorder %s34_s25, %s498_s12  ;;  %p504_p5 = scmp.lt.s32.totalorder %s498_s12, %s498_s12 }
   0xd   :  { %p505_p6 = por %p504_p5, %p503_p4 }
   0xf   :  { %p506_p7 = pnand %p505_p6, %p499_p3 }
  0x11   :  { %509 = shalt.err (!%p506_p7)
}
  0x12   :  { %s584_s13 = smov 64   ;;  %s585_s14 = smov 4  }
  0x13   :  { %39 = dma.hbm_to_vmem [thread:$0]  %s707_s1, 1024, %s34_s25, [#allocation7], %s584_s13, %s584_s13, %s585_s14  }
  0x14   :  { %s510_s19 = scalar_lea.hbm %s706_s0, 128 }
  0x15   :  { %p511_p8 = scmp.ne.s32.totalorder %s706_s0, %s510_s19  ;;  %p514_p9 = scmp.lt.u32.totalorder %s510_s19, %s706_s0 }
  0x17   :  { %p516_p10 = pnand %p514_p9, %p511_p8 }
  0x19   :  { %519 = shalt.err (!%p516_p10)
}
  0x1a   :  { %s520_s24 = scalar_lea.vmem %s630_s27, 128  ;;  %p525_p12 = scmp.lt.s32.totalorder %s630_s27, %s630_s27 }
  0x1b   :  { %p521_p11 = scmp.ne.s32.totalorder %s630_s27, %s520_s24  ;;  %p526_p13 = scmp.lt.s32.totalorder %s520_s24, %s520_s24 }
  0x1d   :  { %p527_p0 = por %p526_p13, %p525_p12 }
  0x1f   :  { %p528_p1 = pnand %p527_p0, %p521_p11 }
  0x21   :  { %531 = shalt.err (!%p528_p1)
}
  0x22   :  { %27 = dma.hbm_to_vmem [thread:$0]  %s706_s0, 128, %s630_s27, [#allocation4], %s584_s13, %s584_s13, %s585_s14  }
  0x23   :  { %s586_s26 = smov [#allocation8]   ;;  %s532_s8 = scalar_lea.hbm %s709_s3, 1024 }
  0x24   :  { %s47_s28 = sshll.u32 %s586_s26, 4  ;;  %p533_p2 = scmp.ne.s32.totalorder %s709_s3, %s532_s8  ;;  %s48_s28 = int_to_ptr.vmem [resolvable:$true] %s47_s28 }
  0x25   :  { %p536_p3 = scmp.lt.u32.totalorder %s532_s8, %s709_s3 }
  0x27   :  { %p538_p4 = pnand %p536_p3, %p533_p2 }
  0x29   :  { %541 = shalt.err (!%p538_p4)
}
  0x2a   :  { %s542_s15 = scalar_lea.vmem %s48_s28, 1024  ;;  %p547_p6 = scmp.lt.s32.totalorder %s48_s28, %s48_s28 }
  0x2b   :  { %p543_p5 = scmp.ne.s32.totalorder %s48_s28, %s542_s15  ;;  %p548_p7 = scmp.lt.s32.totalorder %s542_s15, %s542_s15 }
  0x2d   :  { %p549_p8 = por %p548_p7, %p547_p6 }
  0x2f   :  { %p550_p9 = pnand %p549_p8, %p543_p5 }
  0x31   :  { %553 = shalt.err (!%p550_p9)
}
  0x32   :  { %53 = dma.hbm_to_vmem [thread:$0]  %s709_s3, 1024, %s48_s28, [#allocation7], %s584_s13, %s584_s13, %s585_s14  }
  0x33   :  { %576 = dma.done.wait [#allocation4], 128  }
  0x34   :  { %577 = vsyncadd [#allocation4], 4294967168 }
  0x35   :  { %578 = dma.done.wait [#allocation7], 2048  }
  0x36   :  { %579 = vsyncadd [#allocation7], 4294965248  ;;  %v587_v0 = vmov 0.0   ;;  %vm588_vm0 = vmmov 0   ;;  %v467_v1 = vld [vmem:[#allocation6] sm:$0xff]   ;;  %v468_v2 = vld [vmem:[#allocation6 + $0x8] sm:$0xff]   ;;  %v321_v40 = vstv %s712_s6 }
  0x37   :  { %419 = vmatprep.subr.bf16.mxu0 %v587_v0  ;;  %435 = vmatprep.mubr.msk.bf16.mxu0 %vm588_vm0, %v587_v0  ;;  %v469_v3 = vld [vmem:[#allocation6 + $0x10] sm:$0xff]   ;;  %v476_v4 = vld [vmem:[#allocation8] sm:$0xff]   ;;  %v470_v5 = vld [vmem:[#allocation6 + $0x18] sm:$0xff]   ;;  %vm362_vm1 = vcmask 122880  }
  0x38   :  { %439 = vmatprep.subr.bf16.mxu1 %v587_v0  ;;  %455 = vmatprep.mubr.msk.bf16.mxu1 %vm588_vm0, %v587_v0  ;;  %v477_v6 = vld [vmem:[#allocation8 + $0x8] sm:$0xff]   ;;  %v471_v7 = vld [vmem:[#allocation6 + $0x20] sm:$0xff]   ;;  %v478_v8 = vld [vmem:[#allocation8 + $0x10] sm:$0xff]  }
  0x39   :  { %420 = vmatpush3.bf16.msra.mxu0 %v467_v1  ;;  %440 = vmatpush3.bf16.msra.mxu1 %v476_v4  ;;  %v472_v9 = vld [vmem:[#allocation6 + $0x28] sm:$0xff]   ;;  %v479_v10 = vld [vmem:[#allocation8 + $0x18] sm:$0xff]   ;;  %v473_v11 = vld [vmem:[#allocation6 + $0x30] sm:$0xff]  }
  0x3a   :  { %421 = vmatprep.subr.bf16.mxu0 %v587_v0  ;;  %441 = vmatprep.subr.bf16.mxu1 %v587_v0  ;;  %v480_v12 = vld [vmem:[#allocation8 + $0x20] sm:$0xff]   ;;  %v474_v13 = vld [vmem:[#allocation6 + $0x38] sm:$0xff]   ;;  %v481_v14 = vld [vmem:[#allocation8 + $0x28] sm:$0xff]  }
  0x3b   :  { %v475_v15 = vld [vmem:[#allocation3] sm:$0xff]   ;;  %v482_v16 = vld [vmem:[#allocation8 + $0x30] sm:$0xff]  }
  0x3c   :  { %v483_v17 = vld [vmem:[#allocation8 + $0x38] sm:$0xff]  }
  0x3d   :  { %422 = vmatpush3.bf16.msra.mxu0 %v468_v2  ;;  %442 = vmatpush3.bf16.msra.mxu1 %v477_v6  ;;  %v380_v18 = vld [vmem:[%s708_s2] ss:$0 sm:$0xff] }
  0x3e   :  { %423 = vmatprep.subr.bf16.mxu0 %v587_v0  ;;  %443 = vmatprep.subr.bf16.mxu1 %v587_v0  ;;  %v390_v28 = vld [vmem:[%s710_s4] ss:$0 sm:$0xff]  ;;  %s589_s4 = smov [#allocation9]  }
  0x3f   :  { %v399_v33 = vld [vmem:[%s711_s5] ss:$0 sm:$0xff]  ;;  %s370_s5 = sshll.u32 %s589_s4, 4  ;;  %s371_s5 = int_to_ptr.vmem [resolvable:$true] %s370_s5 }
  0x40   :  { %s554_s20 = scalar_lea.vmem %s371_s5, 16  ;;  %s558_s6 = scalar_lea.vmem %s371_s5, 32 }
  0x41   :  { %424 = vmatpush3.bf16.msra.mxu0 %v469_v3  ;;  %444 = vmatpush3.bf16.msra.mxu1 %v478_v8  ;;  %p555_p10 = scmp.ne.s32.totalorder %s371_s5, %s554_s20  ;;  %p559_p11 = scmp.lt.s32.totalorder %s371_s5, %s371_s5 }
  0x42   :  { %425 = vmatprep.subr.bf16.mxu0 %v587_v0  ;;  %445 = vmatprep.subr.bf16.mxu1 %v587_v0  ;;  %p560_p12 = scmp.lt.s32.totalorder %s558_s6, %s554_s20 }
  0x44   :  { %p561_p13 = por %p560_p12, %p559_p11 }
  0x45   :  { %426 = vmatpush3.bf16.msra.mxu0 %v470_v5  ;;  %446 = vmatpush3.bf16.msra.mxu1 %v479_v10 }
  0x46   :  { %427 = vmatprep.subr.bf16.mxu0 %v587_v0  ;;  %447 = vmatprep.subr.bf16.mxu1 %v587_v0  ;;  %p562_p0 = pnand %p561_p13, %p555_p10 }
  0x49   :  { %428 = vmatpush3.bf16.msra.mxu0 %v471_v7  ;;  %448 = vmatpush3.bf16.msra.mxu1 %v480_v12 }
  0x4a   :  { %429 = vmatprep.subr.bf16.mxu0 %v587_v0  ;;  %449 = vmatprep.subr.bf16.mxu1 %v587_v0 }
  0x4d   :  { %430 = vmatpush3.bf16.msra.mxu0 %v472_v9  ;;  %450 = vmatpush3.bf16.msra.mxu1 %v481_v14 }
  0x4e   :  { %431 = vmatprep.subr.bf16.mxu0 %v587_v0  ;;  %451 = vmatprep.subr.bf16.mxu1 %v587_v0 }
  0x51   :  { %432 = vmatpush3.bf16.msra.mxu0 %v473_v11  ;;  %452 = vmatpush3.bf16.msra.mxu1 %v482_v16 }
  0x52   :  { %433 = vmatprep.subr.bf16.mxu0 %v587_v0  ;;  %453 = vmatprep.subr.bf16.mxu1 %v587_v0 }
  0x55   :  { %434 = vmatpush3.bf16.msra.mxu0 %v474_v13  ;;  %454 = vmatpush3.bf16.msra.mxu1 %v483_v17 }
  0x58   :  { %436 = vmatmul.mubr.bf16.vlgmr.msra.gmra.mrb[0].mxu0 %v475_v15 }
 0x12b   :  { %v183_v19 = vpop.f32.mrb[0].mxu0 }
 0x12c   :  { %v184_v20 = vadd.f32 %v380_v18, %v183_v19  ;;  %v437_v21 = vpop.f32.mrb[1].mxu0 }
 0x12d   :  { %v186_v22 = vpop.f32.mrb[2].mxu0 }
 0x12e   :  { %v187_v23 = vadd.f32 %v380_v18, %v186_v22  ;;  %v438_v24 = vpop.f32.mrb[3].mxu0  ;;  %v190_v25 = vmax.f32 %v184_v20, 0.0 }
 0x130   :  { %v191_v26 = vmax.f32 %v187_v23, 0.0 }
 0x132   :  { %v192_v27 = vpack.c.bf16 %v191_v26, %v190_v25 }
 0x134   :  { %456 = vmatmul.mubr.bf16.vlgmr.msra.gmra.mrb[0].mxu1 %v192_v27 }
 0x207   :  { %v298_v29 = vpop.f32.mrb[0].mxu1 }
 0x208   :  { %v299_v30 = vadd.f32 %v390_v28, %v298_v29  ;;  %v457_v31 = vpop.f32.mrb[1].mxu1 }
 0x209   :  { %v301_v32 = vpop.f32.mrb[2].mxu1 }
 0x20a   :  { %v305_v34 = vmax.f32 %v299_v30, 0.0  ;;  %v302_v35 = vadd.f32 %v390_v28, %v301_v32  ;;  %v458_v36 = vpop.f32.mrb[3].mxu1 }
 0x20c   :  { %v306_v37 = vmax.f32 %v302_v35, 0.0  ;;  %v314_v38 = vmul.f32 %v399_v33, %v305_v34 }
 0x20e   :  { %316 = vadd.xlane.f32.xlu0 %v314_v38  ;;  %v315_v39 = vmul.f32 %v399_v33, %v306_v37 }
 0x212   :  { %318 = vadd.xlane.f32.xlu0 %v315_v39 }
 0x29b   :  { %v317_v41 = vpop.xlane.xlu0 %316 }
 0x29c   :  { %v322_v42 = vadd.f32 %v321_v40, %v317_v41 }
 0x29e   :  { %324 = vxpose.xlu1.b32.start [1/2] (short) (narrow) %v322_v42, 8 }
 0x29f   :  { %v319_v43 = vpop.xlane.xlu0 %318 }
 0x2a0   :  { %v323_v44 = vadd.f32 %v321_v40, %v319_v43 }
 0x2a2   :  { %325 = vxpose.xlu1.b32.end [2/2] (short) (narrow) %v323_v44, 8 }
 0x31e   :  { %v340_v45 = vpop.trf.xlu1 }
 0x31f   :  { %v400_v46 = vmul.f32 -1.442695, %v340_v45 }
 0x321   :  { %484 = vpow2.f32 %v400_v46 }
 0x32b   :  { %v485_v47 = vpop.eup %484 }
 0x32c   :  { %v359_v48 = vadd.f32 1.0, %v485_v47 }
 0x32e   :  { %486 = vrcp.f32 %v359_v48 }
 0x338   :  { %v487_v49 = vpop.eup %486 }
 0x339   :  { %363 = vst.msk [vmem:[#allocation9] sm:$0x1] %vm362_vm1, %v487_v49 }
 0x33a   :  { %565 = shalt.err (!%p562_p0)
}
 0x33b   :  { %s566_s23 = scalar_lea.hbm %s713_s7, 16 }
 0x33c   :  { %p567_p1 = scmp.ne.s32.totalorder %s713_s7, %s566_s23  ;;  %p570_p2 = scmp.lt.u32.totalorder %s566_s23, %s713_s7 }
 0x33e   :  { %p572_p3 = pnand %p570_p2, %p567_p1 }
 0x340   :  { %575 = shalt.err (!%p572_p3)
}
 0x341   :  { %373 = dma.vmem_to_hbm [thread:$0]  %s371_s5, 16, %s713_s7, [#allocation5]  }
 0x342   :  { %580 = dma.done.wait [#allocation5], 16  }
 0x343   :  { %581 = vsyncadd [#allocation5], 4294967280 }
 0x344   :  { %377 = vsyncpa [#allocation4], 1 }
 0x345   :  { %378 = vsyncpa [#allocation7], 1 }
 0x346   :  { %379 = vsyncpa [#allocation5], 1 }

// kernel: tpu_custom_call.1
= control target key start
LH: loop header
LB: loop body
LE: loop exit
PB: predicated region body
PF: predicated region fallthrough
CT: control target
= control target key end

     0   :  { %13 = vsyncpa [#allocation4], 0  ;;  %s643_s0 = inlined_call_operand.hbm [shape: bf16[16,128], index: 0, kind: input, shape index: {}]   ;;  %s644_s1 = inlined_call_operand.hbm [shape: bf16[128,128], index: 1, kind: input, shape index: {}]   ;;  %s645_s2 = inlined_call_operand.vmem [shape: f32[1,128], index: 2, kind: input, shape index: {}]   ;;  %s646_s3 = inlined_call_operand.hbm [shape: bf16[128,128], index: 3, kind: input, shape index: {}]   ;;  %s647_s4 = inlined_call_operand.vmem [shape: f32[1,128], index: 4, kind: input, shape index: {}]   ;;  %s648_s5 = inlined_call_operand.vmem [shape: f32[1,128], index: 5, kind: input, shape index: {}]   ;;  %s649_s6 = inlined_call_operand.<no memory space> [shape: f32[1,1], index: 6, kind: input, shape index: {}]   ;;  %s650_s7 = inlined_call_operand.vmem [shape: f32[16,1], index: 7, kind: output, shape index: {}]  }
   0x1   :  { %14 = vsyncpa [#allocation6], 0  ;;  %s526_s24 = smov [#allocation5]   ;;  %s527_s26 = smov [#allocation3]  }
   0x2   :  { %s32_s25 = sshll.u32 %s526_s24, 4  ;;  %s20_s27 = sshll.u32 %s527_s26, 4  ;;  %s33_s25 = int_to_ptr.vmem [resolvable:$true] %s32_s25  ;;  %s573_s27 = int_to_ptr.vmem [resolvable:$true] %s20_s27 }
   0x3   :  { %s456_s30 = scalar_lea.hbm %s644_s1, 1024 }
   0x4   :  { %p457_p0 = scmp.ne.s32.totalorder %s644_s1, %s456_s30  ;;  %p460_p1 = scmp.lt.u32.totalorder %s456_s30, %s644_s1 }
   0x6   :  { %p462_p2 = pnand %p460_p1, %p457_p0 }
   0x8   :  { %465 = shalt.err (!%p462_p2)
}
   0x9   :  { %s466_s12 = scalar_lea.vmem %s33_s25, 1024  ;;  %p471_p4 = scmp.lt.s32.totalorder %s33_s25, %s33_s25 }
   0xa   :  { %p467_p3 = scmp.ne.s32.totalorder %s33_s25, %s466_s12  ;;  %p472_p5 = scmp.lt.s32.totalorder %s466_s12, %s466_s12 }
   0xc   :  { %p473_p6 = por %p472_p5, %p471_p4 }
   0xe   :  { %p474_p7 = pnand %p473_p6, %p467_p3 }
  0x10   :  { %477 = shalt.err (!%p474_p7)
}
  0x11   :  { %s528_s13 = smov 64   ;;  %s529_s14 = smov 4  }
  0x12   :  { %38 = dma.hbm_to_vmem [thread:$0]  %s644_s1, 1024, %s33_s25, [#allocation6], %s528_s13, %s528_s13, %s529_s14  }
  0x13   :  { %s478_s19 = scalar_lea.hbm %s643_s0, 128 }
  0x14   :  { %p479_p8 = scmp.ne.s32.totalorder %s643_s0, %s478_s19  ;;  %p482_p9 = scmp.lt.u32.totalorder %s478_s19, %s643_s0 }
  0x16   :  { %p484_p10 = pnand %p482_p9, %p479_p8 }
  0x18   :  { %487 = shalt.err (!%p484_p10)
}
  0x19   :  { %s488_s24 = scalar_lea.vmem %s573_s27, 128  ;;  %p493_p12 = scmp.lt.s32.totalorder %s573_s27, %s573_s27 }
  0x1a   :  { %p489_p11 = scmp.ne.s32.totalorder %s573_s27, %s488_s24  ;;  %p494_p13 = scmp.lt.s32.totalorder %s488_s24, %s488_s24 }
  0x1c   :  { %p495_p0 = por %p494_p13, %p493_p12 }
  0x1e   :  { %p496_p1 = pnand %p495_p0, %p489_p11 }
  0x20   :  { %499 = shalt.err (!%p496_p1)
}
  0x21   :  { %26 = dma.hbm_to_vmem [thread:$0]  %s643_s0, 128, %s573_s27, [#allocation4], %s528_s13, %s528_s13, %s529_s14  }
  0x22   :  { %s530_s26 = smov [#allocation7]   ;;  %s500_s8 = scalar_lea.hbm %s646_s3, 1024 }
  0x23   :  { %s46_s28 = sshll.u32 %s530_s26, 4  ;;  %p501_p2 = scmp.ne.s32.totalorder %s646_s3, %s500_s8  ;;  %s47_s28 = int_to_ptr.vmem [resolvable:$true] %s46_s28 }
  0x24   :  { %p504_p3 = scmp.lt.u32.totalorder %s500_s8, %s646_s3 }
  0x26   :  { %p506_p4 = pnand %p504_p3, %p501_p2 }
  0x28   :  { %509 = shalt.err (!%p506_p4)
}
  0x29   :  { %s510_s15 = scalar_lea.vmem %s47_s28, 1024  ;;  %p515_p6 = scmp.lt.s32.totalorder %s47_s28, %s47_s28 }
  0x2a   :  { %p511_p5 = scmp.ne.s32.totalorder %s47_s28, %s510_s15  ;;  %p516_p7 = scmp.lt.s32.totalorder %s510_s15, %s510_s15 }
  0x2c   :  { %p517_p8 = por %p516_p7, %p515_p6 }
  0x2e   :  { %p518_p9 = pnand %p517_p8, %p511_p5 }
  0x30   :  { %521 = shalt.err (!%p518_p9)
}
  0x31   :  { %52 = dma.hbm_to_vmem [thread:$0]  %s646_s3, 1024, %s47_s28, [#allocation6], %s528_s13, %s528_s13, %s529_s14  }
  0x32   :  { %522 = dma.done.wait [#allocation4], 128  }
  0x33   :  { %523 = vsyncadd [#allocation4], 4294967168 }
  0x34   :  { %524 = dma.done.wait [#allocation6], 2048  }
  0x35   :  { %525 = vsyncadd [#allocation6], 4294965248  ;;  %v531_v0 = vmov 0.0   ;;  %vm532_vm0 = vmmov 0   ;;  %v431_v1 = vld [vmem:[#allocation5] sm:$0xff]   ;;  %v432_v2 = vld [vmem:[#allocation5 + $0x8] sm:$0xff]   ;;  %v320_v40 = vstv %s649_s6 }
  0x36   :  { %384 = vmatprep.subr.bf16.mxu0 %v531_v0  ;;  %400 = vmatprep.mubr.msk.bf16.mxu0 %vm532_vm0, %v531_v0  ;;  %v433_v3 = vld [vmem:[#allocation5 + $0x10] sm:$0xff]   ;;  %v440_v4 = vld [vmem:[#allocation7] sm:$0xff]   ;;  %v434_v5 = vld [vmem:[#allocation5 + $0x18] sm:$0xff]   ;;  %vm335_vm1 = vcmask 7168  }
  0x37   :  { %404 = vmatprep.subr.bf16.mxu1 %v531_v0  ;;  %420 = vmatprep.mubr.msk.bf16.mxu1 %vm532_vm0, %v531_v0  ;;  %v441_v6 = vld [vmem:[#allocation7 + $0x8] sm:$0xff]   ;;  %v435_v7 = vld [vmem:[#allocation5 + $0x20] sm:$0xff]   ;;  %v442_v8 = vld [vmem:[#allocation7 + $0x10] sm:$0xff]  }
  0x38   :  { %385 = vmatpush3.bf16.msra.mxu0 %v431_v1  ;;  %405 = vmatpush3.bf16.msra.mxu1 %v440_v4  ;;  %v436_v9 = vld [vmem:[#allocation5 + $0x28] sm:$0xff]   ;;  %v443_v10 = vld [vmem:[#allocation7 + $0x18] sm:$0xff]   ;;  %v437_v11 = vld [vmem:[#allocation5 + $0x30] sm:$0xff]  }
  0x39   :  { %386 = vmatprep.subr.bf16.mxu0 %v531_v0  ;;  %406 = vmatprep.subr.bf16.mxu1 %v531_v0  ;;  %v444_v12 = vld [vmem:[#allocation7 + $0x20] sm:$0xff]   ;;  %v438_v13 = vld [vmem:[#allocation5 + $0x38] sm:$0xff]   ;;  %v445_v14 = vld [vmem:[#allocation7 + $0x28] sm:$0xff]  }
  0x3a   :  { %v439_v15 = vld [vmem:[#allocation3] sm:$0xff]   ;;  %v446_v16 = vld [vmem:[#allocation7 + $0x30] sm:$0xff]  }
  0x3b   :  { %v447_v17 = vld [vmem:[#allocation7 + $0x38] sm:$0xff]  }
  0x3c   :  { %387 = vmatpush3.bf16.msra.mxu0 %v432_v2  ;;  %407 = vmatpush3.bf16.msra.mxu1 %v441_v6  ;;  %v344_v18 = vld [vmem:[%s645_s2] ss:$0 sm:$0xff] }
  0x3d   :  { %388 = vmatprep.subr.bf16.mxu0 %v531_v0  ;;  %408 = vmatprep.subr.bf16.mxu1 %v531_v0  ;;  %v354_v28 = vld [vmem:[%s647_s4] ss:$0 sm:$0xff] }
  0x3e   :  { %v363_v33 = vld [vmem:[%s648_s5] ss:$0 sm:$0xff] }
  0x40   :  { %389 = vmatpush3.bf16.msra.mxu0 %v433_v3  ;;  %409 = vmatpush3.bf16.msra.mxu1 %v442_v8 }
  0x41   :  { %390 = vmatprep.subr.bf16.mxu0 %v531_v0  ;;  %410 = vmatprep.subr.bf16.mxu1 %v531_v0 }
  0x44   :  { %391 = vmatpush3.bf16.msra.mxu0 %v434_v5  ;;  %411 = vmatpush3.bf16.msra.mxu1 %v443_v10 }
  0x45   :  { %392 = vmatprep.subr.bf16.mxu0 %v531_v0  ;;  %412 = vmatprep.subr.bf16.mxu1 %v531_v0 }
  0x48   :  { %393 = vmatpush3.bf16.msra.mxu0 %v435_v7  ;;  %413 = vmatpush3.bf16.msra.mxu1 %v444_v12 }
  0x49   :  { %394 = vmatprep.subr.bf16.mxu0 %v531_v0  ;;  %414 = vmatprep.subr.bf16.mxu1 %v531_v0 }
  0x4c   :  { %395 = vmatpush3.bf16.msra.mxu0 %v436_v9  ;;  %415 = vmatpush3.bf16.msra.mxu1 %v445_v14 }
  0x4d   :  { %396 = vmatprep.subr.bf16.mxu0 %v531_v0  ;;  %416 = vmatprep.subr.bf16.mxu1 %v531_v0 }
  0x50   :  { %397 = vmatpush3.bf16.msra.mxu0 %v437_v11  ;;  %417 = vmatpush3.bf16.msra.mxu1 %v446_v16 }
  0x51   :  { %398 = vmatprep.subr.bf16.mxu0 %v531_v0  ;;  %418 = vmatprep.subr.bf16.mxu1 %v531_v0 }
  0x54   :  { %399 = vmatpush3.bf16.msra.mxu0 %v438_v13  ;;  %419 = vmatpush3.bf16.msra.mxu1 %v447_v17 }
  0x57   :  { %401 = vmatmul.mubr.bf16.vlgmr.msra.gmra.mrb[0].mxu0 %v439_v15 }
 0x12a   :  { %v182_v19 = vpop.f32.mrb[0].mxu0 }
 0x12b   :  { %v183_v20 = vadd.f32 %v344_v18, %v182_v19  ;;  %v402_v21 = vpop.f32.mrb[1].mxu0 }
 0x12c   :  { %v185_v22 = vpop.f32.mrb[2].mxu0 }
 0x12d   :  { %v186_v23 = vadd.f32 %v344_v18, %v185_v22  ;;  %v403_v24 = vpop.f32.mrb[3].mxu0  ;;  %v189_v25 = vmax.f32 %v183_v20, 0.0 }
 0x12f   :  { %v190_v26 = vmax.f32 %v186_v23, 0.0 }
 0x131   :  { %v191_v27 = vpack.c.bf16 %v190_v26, %v189_v25 }
 0x133   :  { %421 = vmatmul.mubr.bf16.vlgmr.msra.gmra.mrb[0].mxu1 %v191_v27 }
 0x206   :  { %v297_v29 = vpop.f32.mrb[0].mxu1 }
 0x207   :  { %v298_v30 = vadd.f32 %v354_v28, %v297_v29  ;;  %v422_v31 = vpop.f32.mrb[1].mxu1 }
 0x208   :  { %v300_v32 = vpop.f32.mrb[2].mxu1 }
 0x209   :  { %v304_v34 = vmax.f32 %v298_v30, 0.0  ;;  %v301_v35 = vadd.f32 %v354_v28, %v300_v32  ;;  %v423_v36 = vpop.f32.mrb[3].mxu1 }
 0x20b   :  { %v305_v37 = vmax.f32 %v301_v35, 0.0  ;;  %v313_v38 = vmul.f32 %v363_v33, %v304_v34 }
 0x20d   :  { %315 = vadd.xlane.f32.xlu0 %v313_v38  ;;  %v314_v39 = vmul.f32 %v363_v33, %v305_v37 }
 0x211   :  { %317 = vadd.xlane.f32.xlu0 %v314_v39 }
 0x29a   :  { %v316_v41 = vpop.xlane.xlu0 %315 }
 0x29b   :  { %v321_v42 = vadd.f32 %v320_v40, %v316_v41 }
 0x29d   :  { %v364_v43 = vmul.f32 -1.442695, %v321_v42 }
 0x29e   :  { %v318_v44 = vpop.xlane.xlu0 %317 }
 0x29f   :  { %448 = vpow2.f32 %v364_v43  ;;  %v322_v45 = vadd.f32 %v320_v40, %v318_v44 }
 0x2a1   :  { %v365_v46 = vmul.f32 -1.442695, %v322_v45 }
 0x2a3   :  { %450 = vpow2.f32 %v365_v46 }
 0x2a9   :  { %v449_v47 = vpop.eup %448 }
 0x2aa   :  { %v329_v48 = vadd.f32 1.0, %v449_v47 }
 0x2ac   :  { %452 = vrcp.f32 %v329_v48 }
 0x2ad   :  { %v451_v49 = vpop.eup %450 }
 0x2ae   :  { %v330_v50 = vadd.f32 1.0, %v451_v49 }
 0x2b0   :  { %454 = vrcp.f32 %v330_v50 }
 0x2b6   :  { %v453_v51 = vpop.eup %452 }
 0x2b7   :  { %336 = vst.msk [vmem:[%s650_s7] sm:$0xff] %vm335_vm1, %v453_v51 }
 0x2ba   :  { %v455_v52 = vpop.eup %454 }
 0x2bb   :  { %337 = vst.msk [vmem:[%s650_s7 + $0x8] sm:$0xff] %vm335_vm1, %v455_v52 }
 0x2bc   :  { %342 = vsyncpa [#allocation4], 1 }
 0x2bd   :  { %343 = vsyncpa [#allocation6], 1 }

</bundles_post_ra>
